<compile_context>
chip_gen: v7x
topology: tpu7x:2x2x1
jax: 0.10.0
libtpu: 0.0.40
codegen_flags: <defaults>
</compile_context>

<pallas_src>
import functools
import math

import jax
import jax.numpy as jnp
from jax.experimental import pallas as pl
from jax.experimental.pallas import tpu as pltpu


def _primary_caps_kernel(x_ref, w_ref, b_ref, out_ref, xpad_ref, *, K, W, D, pad):
    # x_ref:    (TB, CT, HW)          input tile (channels on sublanes, H*W on lanes)
    # w_ref:    (K*K, CT, 1)          depthwise taps (per-channel scalars)
    # b_ref:    (CT, 1)               bias
    # out_ref:  (TB, CT, HW)          squashed depthwise-conv output (pre-permute layout)
    # xpad_ref: (TB, CT, HW + 2*pad)  f32 scratch: tile with a flat zero halo on each side
    TB, CT, HW = x_ref.shape
    p = K // 2

    # Stage the tile into the padded scratch (lane-aligned stores: pad % 128 == 0).
    zeros_halo = jnp.zeros((TB, CT, pad), jnp.float32)
    xpad_ref[:, :, :pad] = zeros_halo
    xpad_ref[:, :, pad + HW:] = zeros_halo
    xpad_ref[:, :, pad:pad + HW] = x_ref[...].astype(jnp.float32)

    # Column masks: depend only on (lane % W) and dj -> shape (1,1,HW), K-1 of them.
    # Row out-of-range taps read zeros from the flat halo, so no row masks are needed.
    wcol = jax.lax.broadcasted_iota(jnp.int32, (1, 1, HW), 2) % W

    wf = w_ref[...].astype(jnp.float32)        # hoisted cast, (K*K, CT, 1)
    bias = b_ref[...].astype(jnp.float32)      # (CT, 1) broadcasts over (TB, CT, HW)
    acc = jnp.broadcast_to(bias, (TB, CT, HW))

    # Depthwise conv: tap (di, dj) reads the padded tile at flat lane offset
    # pad + di*W + dj.  The column mask for a given dj is factored out of the di sum.
    for dj in range(-p, p + 1):
        part = None
        for di in range(-p, p + 1):
            off = pad + di * W + dj                           # static offset
            xs = xpad_ref[:, :, off:off + HW]                 # (TB, CT, HW) f32
            w_tap = wf[(di + p) * K + (dj + p)]               # (CT, 1)
            term = w_tap * xs
            part = term if part is None else part + term
        if dj > 0:
            part = jnp.where(wcol < (W - dj), part, 0.0)
        elif dj < 0:
            part = jnp.where(wcol >= (-dj), part, 0.0)
        acc = acc + part

    # Squash over each capsule group of D consecutive channels.  This commutes with the
    # wrapper's view/permute (a pure index relabelling), so it matches the PyTorch order.
    GT = CT // D
    for g in range(GT):
        s = acc[:, g * D:(g + 1) * D, :]                      # (TB, D, HW)
        ssum = jnp.sum(s * s, axis=1, keepdims=True)          # (TB, 1, HW)
        inv_n = jax.lax.rsqrt(ssum + 1e-30)                   # guard: rsqrt(0) -> finite
        n = ssum * inv_n                                      # == sqrt(ssum)
        scale = (1.0 - jnp.exp(-n)) * inv_n                   # == (1 - 1/exp(n)) / n  (eps ~ 1e-20)
        out_ref[:, g * D:(g + 1) * D, :] = (s * scale).astype(out_ref.dtype)


def _choose_tiles(B, F, D, HW):
    """Pick (TB, CT): batch rows and channel rows per grid step.

    CT keeps squash groups whole (multiple of D) and respects the TPU block rule
    (CT == F, or CT % 8 == 0 and F % CT == 0).  Blocks target ~1 MiB of f32 so the
    per-step overhead / DMA issue is amortised, while keeping >= 4 grid steps when the
    problem allows it (>= 2 parallel steps per v7x TensorCore).
    """
    ct = F
    max_ct_rows = max(D, (2 << 20) // (HW * 4))               # cap one f32 block ~2 MiB
    if ct > max_ct_rows:
        step = D * 8 // math.gcd(D, 8)
        cand = [c for c in range(step, F + 1, step) if F % c == 0 and c <= max_ct_rows]
        if cand:
            ct = cand[-1]

    target = 1 << 20
    tb = max(1, min(B, target // max(1, ct * HW * 4)))
    while tb > 1 and B % tb != 0:
        tb -= 1
    while tb > 1 and (B // tb) * (F // ct) < 4:
        tb = max(1, tb // 2)
        while tb > 1 and B % tb != 0:
            tb -= 1
    return tb, ct


def primary_caps_forward(x, weight, bias, *, K, D, stride=1, eps=1e-20):
    """x: (B, I, H, W); weight: (F, 1, K, K) depthwise (I == F); bias: (F,).

    x/weight/bias may be f32 or bf16 (bf16 halves HBM/DMA bytes); arithmetic is f32.
    """
    # TODO(synk): stride > 1 not implemented in the kernel (module default is 1).
    assert stride == 1
    del eps  # squash uses the algebraically equivalent exp(-n)/rsqrt form (diff ~1e-20)
    B, I, H, W = x.shape
    F = weight.shape[0]
    assert I == F, "depthwise conv (groups == F) requires in_ch == out_ch here"
    assert F % D == 0
    G = F // D
    HW = H * W
    p = K // 2
    pf = p * W + p                           # flat halo actually needed per side
    pad = -(-pf // 128) * 128                # round up so the staging stores stay aligned

    # Free (contiguous) reshapes only -- no HBM copies on the input side.
    x2 = x.reshape(B, F, HW)
    w3 = jnp.transpose(weight.reshape(F, K * K), (1, 0)).reshape(K * K, F, 1)
    b2 = bias.reshape(F, 1)

    TB, CT = _choose_tiles(B, F, D, HW)
    grid = (B // TB, F // CT)

    kernel = functools.partial(_primary_caps_kernel, K=K, W=W, D=D, pad=pad)

    y = pl.pallas_call(
        kernel,
        out_shape=jax.ShapeDtypeStruct((B, F, HW), x.dtype),
        grid=grid,
        in_specs=[
            pl.BlockSpec((TB, CT, HW), lambda bi, ci: (bi, ci, 0)),
            pl.BlockSpec((K * K, CT, 1), lambda bi, ci: (0, ci, 0)),
            pl.BlockSpec((CT, 1), lambda bi, ci: (ci, 0)),
        ],
        out_specs=pl.BlockSpec((TB, CT, HW), lambda bi, ci: (bi, ci, 0)),
        scratch_shapes=[pltpu.VMEM((TB, CT, HW + 2 * pad), jnp.float32)],
        compiler_params=pltpu.CompilerParams(
            dimension_semantics=("parallel", "parallel"),
            # Safe on v7x's 64 MiB physical VMEM, above v5e/v6e scoped defaults.
            vmem_limit_bytes=32 * 1024 * 1024,
        ),
    )(x2, w3, b2)

    # Layout glue identical to the PyTorch view/permute/view:
    # (B, F, HW) -> (B, G, D, H, W) -> (B, G, W, D, H) -> (B, G*W, D, H).
    z = y.reshape(B, G, D, H, W)
    z = jnp.transpose(z, (0, 1, 4, 2, 3))
    return z.reshape(B, G * W, D, H)


def _reference_forward(x, weight, bias, *, K, D, stride=1, eps=1e-20):
    """Pure-JAX reference reproducing the PyTorch forward exactly."""
    p = K // 2
    F = weight.shape[0]
    y = jax.lax.conv_general_dilated(
        x, weight, window_strides=(stride, stride), padding=((p, p), (p, p)),
        dimension_numbers=("NCHW", "OIHW", "NCHW"), feature_group_count=F)
    y = y + bias.reshape(1, -1, 1, 1)
    B, Fc, H, W = y.shape
    z = y.reshape(B, Fc // D, D, H, W)
    z = jnp.transpose(z, (0, 1, 4, 2, 3))
    z = z.reshape(B, -1, D, H)
    n = jnp.sqrt(jnp.sum(z * z, axis=2, keepdims=True))
    return (1.0 - 1.0 / (jnp.exp(n) + eps)) * (z / (n + eps))


if __name__ == "__main__":
    # Small shapes consistent with the module: depthwise conv => I == F, D | F.
    B, I, H, W = 2, 8, 16, 16
    F, K, D, stride = 8, 3, 4, 1

    key = jax.random.PRNGKey(0)
    kx, kw, kb = jax.random.split(key, 3)
    x = jax.random.normal(kx, (B, I, H, W), dtype=jnp.float32)
    weight = jax.random.normal(kw, (F, 1, K, K), dtype=jnp.float32) * 0.1
    bias = jax.random.normal(kb, (F,), dtype=jnp.float32) * 0.01

    # ---- f32 path: tight check against the pure-JAX reference ----
    out = primary_caps_forward(x, weight, bias, K=K, D=D, stride=stride)
    out = jax.block_until_ready(out)
    ref = jax.block_until_ready(
        _reference_forward(x, weight, bias, K=K, D=D, stride=stride))

    assert out.shape == (B, (F // D) * W, D, H), out.shape
    assert bool(jnp.all(jnp.isfinite(out))), "non-finite values in kernel output"
    # Tolerance covers the rsqrt/exp(-n) squash reformulation (errors <~1e-3); any
    # structural/conv error would show up as O(0.1+) differences.
    assert jnp.allclose(out, ref, rtol=5e-3, atol=5e-3), "f32 mismatch vs reference"

    # ---- bf16 HBM-storage path (halves DMA bytes); arithmetic stays f32 ----
    xb = x.astype(jnp.bfloat16)
    wb = weight.astype(jnp.bfloat16)
    bb = bias.astype(jnp.bfloat16)
    out_b = primary_caps_forward(xb, wb, bb, K=K, D=D, stride=stride)
    out_b = jax.block_until_ready(out_b)
    # Compare against the reference run on the same bf16-rounded inputs, so only
    # kernel-internal error + the bf16 output downcast remain.
    ref_b = _reference_forward(
        xb.astype(jnp.float32), wb.astype(jnp.float32), bb.astype(jnp.float32),
        K=K, D=D, stride=stride)
    assert jnp.allclose(out_b.astype(jnp.float32), ref_b, rtol=3e-2, atol=3e-2), \
        "bf16 mismatch vs reference"

    print("KERNEL_OK")
</pallas_src>

<mosaic_0001>
module attributes {stable_mosaic.version = 11 : i64} {
  func.func @_primary_caps_kernel(%arg0: i32, %arg1: i32, %arg2: memref<1x8x256xf32, #tpu.memory_space<vmem>>, %arg3: memref<9x8x1xf32, #tpu.memory_space<vmem>>, %arg4: memref<8x1xf32, #tpu.memory_space<vmem>>, %arg5: memref<1x8x256xf32, #tpu.memory_space<vmem>>, %arg6: memref<1x8x512xf32, #tpu.memory_space<vmem>>) attributes {dimension_semantics = [#tpu.dimension_semantics<parallel>, #tpu.dimension_semantics<parallel>], iteration_bounds = array<i64: 2, 1>, scalar_prefetch = 0 : i64, scratch_operands = 1 : i64, tpu.core_type = #tpu.core_type<tc>, window_params = [{transform_indices = @transform_0, window_bounds = array<i64: 1, 8, 256>}, {transform_indices = @transform_1, window_bounds = array<i64: 9, 8, 1>}, {transform_indices = @transform_2, window_bounds = array<i64: 8, 1>}, {transform_indices = @transform_3, window_bounds = array<i64: 1, 8, 256>}]} {
    %cst = arith.constant 0.000000e+00 : f32
    %0 = vector.broadcast %cst : f32 to vector<1x8x128xf32>
    %c0 = arith.constant 0 : index
    %c0_0 = arith.constant 0 : index
    %c0_1 = arith.constant 0 : index
    %1 = vector.load %arg6[%c0, %c0_0, %c0_1] : memref<1x8x512xf32, #tpu.memory_space<vmem>>, vector<1x8x128xf32>
    tpu.vector_store %arg6[%c0, %c0_0, %c0_1], %0 {strides = array<i32>} : memref<1x8x512xf32, #tpu.memory_space<vmem>>, vector<1x8x128xf32>,
    %c0_2 = arith.constant 0 : index
    %c0_3 = arith.constant 0 : index
    %c384 = arith.constant 384 : index
    %2 = vector.load %arg6[%c0_2, %c0_3, %c384] : memref<1x8x512xf32, #tpu.memory_space<vmem>>, vector<1x8x128xf32>
    tpu.vector_store %arg6[%c0_2, %c0_3, %c384], %0 {strides = array<i32>} : memref<1x8x512xf32, #tpu.memory_space<vmem>>, vector<1x8x128xf32>,
    %c0_4 = arith.constant 0 : index
    %c0_5 = arith.constant 0 : index
    %c0_6 = arith.constant 0 : index
    %3 = vector.load %arg2[%c0_4, %c0_5, %c0_6] : memref<1x8x256xf32, #tpu.memory_space<vmem>>, vector<1x8x256xf32>
    %c0_7 = arith.constant 0 : index
    %c0_8 = arith.constant 0 : index
    %c128 = arith.constant 128 : index
    %4 = vector.load %arg6[%c0_7, %c0_8, %c128] : memref<1x8x512xf32, #tpu.memory_space<vmem>>, vector<1x8x256xf32>
    tpu.vector_store %arg6[%c0_7, %c0_8, %c128], %3 {strides = array<i32>} : memref<1x8x512xf32, #tpu.memory_space<vmem>>, vector<1x8x256xf32>,
    %5 = tpu.iota {dimensions = array<i32: 2>} : vector<1x1x256xi32>
    %c16_i32 = arith.constant 16 : i32
    %c0_i32 = arith.constant 0 : i32
    %6 = arith.cmpi eq, %c16_i32, %c0_i32 : i32
    %c1_i32 = arith.constant 1 : i32
    %7 = arith.select %6, %c1_i32, %c16_i32 : i32
    %8 = vector.broadcast %7 : i32 to vector<1x1x256xi32>
    %9 = arith.remsi %5, %8 : vector<1x1x256xi32>
    %c0_i32_9 = arith.constant 0 : i32
    %10 = vector.broadcast %c0_i32_9 : i32 to vector<1x1x256xi32>
    %11 = arith.cmpi ne, %9, %10 : vector<1x1x256xi32>
    %c0_i32_10 = arith.constant 0 : i32
    %12 = vector.broadcast %c0_i32_10 : i32 to vector<1x1x256xi32>
    %13 = arith.cmpi slt, %9, %12 : vector<1x1x256xi32>
    %c0_i32_11 = arith.constant 0 : i32
    %14 = arith.cmpi slt, %7, %c0_i32_11 : i32
    %15 = vector.broadcast %14 : i1 to vector<1x1x256xi1>
    %16 = vector.broadcast %15 : vector<1x1x256xi1> to vector<1x1x256xi1>
    %17 = arith.xori %13, %16 : vector<1x1x256xi1>
    %18 = arith.andi %17, %11 : vector<1x1x256xi1>
    %19 = vector.broadcast %7 : i32 to vector<1x1x256xi32>
    %20 = arith.addi %9, %19 : vector<1x1x256xi32>
    %21 = arith.select %18, %20, %9 : vector<1x1x256xi1>, vector<1x1x256xi32>
    %c0_12 = arith.constant 0 : index
    %c0_13 = arith.constant 0 : index
    %c0_14 = arith.constant 0 : index
    %22 = vector.load %arg3[%c0_12, %c0_13, %c0_14] : memref<9x8x1xf32, #tpu.memory_space<vmem>>, vector<9x8x1xf32>
    %c0_15 = arith.constant 0 : index
    %c0_16 = arith.constant 0 : index
    %23 = vector.load %arg4[%c0_15, %c0_16] : memref<8x1xf32, #tpu.memory_space<vmem>>, vector<8x1xf32>
    %24 = vector.shape_cast %23 : vector<8x1xf32> to vector<1x8x1xf32>
    %25 = vector.broadcast %24 : vector<1x8x1xf32> to vector<1x8x256xf32>
    %c0_17 = arith.constant 0 : index
    %c0_18 = arith.constant 0 : index
    %c111 = arith.constant 111 : index
    %26 = vector.load %arg6[%c0_17, %c0_18, %c111] : memref<1x8x512xf32, #tpu.memory_space<vmem>>, vector<1x8x256xf32>
    %27 = vector.extract_strided_slice %22 {offsets = [0, 0, 0], sizes = [1, 8, 1], strides = [1, 1, 1]} : vector<9x8x1xf32> to vector<1x8x1xf32>
    %28 = vector.shape_cast %27 : vector<1x8x1xf32> to vector<8x1xf32>
    %29 = vector.shape_cast %28 : vector<8x1xf32> to vector<1x8x1xf32>
    %30 = vector.broadcast %29 : vector<1x8x1xf32> to vector<1x8x256xf32>
    %31 = arith.mulf %30, %26 : vector<1x8x256xf32>
    %c0_19 = arith.constant 0 : index
    %c0_20 = arith.constant 0 : index
    %c127 = arith.constant 127 : index
    %32 = vector.load %arg6[%c0_19, %c0_20, %c127] : memref<1x8x512xf32, #tpu.memory_space<vmem>>, vector<1x8x256xf32>
    %33 = vector.extract_strided_slice %22 {offsets = [3, 0, 0], sizes = [1, 8, 1], strides = [1, 1, 1]} : vector<9x8x1xf32> to vector<1x8x1xf32>
    %34 = vector.shape_cast %33 : vector<1x8x1xf32> to vector<8x1xf32>
    %35 = vector.shape_cast %34 : vector<8x1xf32> to vector<1x8x1xf32>
    %36 = vector.broadcast %35 : vector<1x8x1xf32> to vector<1x8x256xf32>
    %37 = arith.mulf %36, %32 : vector<1x8x256xf32>
    %38 = arith.addf %31, %37 : vector<1x8x256xf32>
    %c0_21 = arith.constant 0 : index
    %c0_22 = arith.constant 0 : index
    %c143 = arith.constant 143 : index
    %39 = vector.load %arg6[%c0_21, %c0_22, %c143] : memref<1x8x512xf32, #tpu.memory_space<vmem>>, vector<1x8x256xf32>
    %40 = vector.extract_strided_slice %22 {offsets = [6, 0, 0], sizes = [1, 8, 1], strides = [1, 1, 1]} : vector<9x8x1xf32> to vector<1x8x1xf32>
    %41 = vector.shape_cast %40 : vector<1x8x1xf32> to vector<8x1xf32>
    %42 = vector.shape_cast %41 : vector<8x1xf32> to vector<1x8x1xf32>
    %43 = vector.broadcast %42 : vector<1x8x1xf32> to vector<1x8x256xf32>
    %44 = arith.mulf %43, %39 : vector<1x8x256xf32>
    %45 = arith.addf %38, %44 : vector<1x8x256xf32>
    %c1_i32_23 = arith.constant 1 : i32
    %46 = vector.broadcast %c1_i32_23 : i32 to vector<1x1x256xi32>
    %47 = arith.cmpi sge, %21, %46 : vector<1x1x256xi32>
    %cst_24 = arith.constant 0.000000e+00 : f32
    %48 = vector.shape_cast %47 : vector<1x1x256xi1> to vector<1x1x256xi1>
    %49 = vector.broadcast %48 : vector<1x1x256xi1> to vector<1x8x256xi1>
    %50 = vector.broadcast %cst_24 : f32 to vector<1x8x256xf32>
    %51 = arith.select %49, %45, %50 : vector<1x8x256xi1>, vector<1x8x256xf32>
    %52 = arith.addf %25, %51 : vector<1x8x256xf32>
    %c0_25 = arith.constant 0 : index
    %c0_26 = arith.constant 0 : index
    %c112 = arith.constant 112 : index
    %53 = vector.load %arg6[%c0_25, %c0_26, %c112] : memref<1x8x512xf32, #tpu.memory_space<vmem>>, vector<1x8x256xf32>
    %54 = vector.extract_strided_slice %22 {offsets = [1, 0, 0], sizes = [1, 8, 1], strides = [1, 1, 1]} : vector<9x8x1xf32> to vector<1x8x1xf32>
    %55 = vector.shape_cast %54 : vector<1x8x1xf32> to vector<8x1xf32>
    %56 = vector.shape_cast %55 : vector<8x1xf32> to vector<1x8x1xf32>
    %57 = vector.broadcast %56 : vector<1x8x1xf32> to vector<1x8x256xf32>
    %58 = arith.mulf %57, %53 : vector<1x8x256xf32>
    %c0_27 = arith.constant 0 : index
    %c0_28 = arith.constant 0 : index
    %c128_29 = arith.constant 128 : index
    %59 = vector.load %arg6[%c0_27, %c0_28, %c128_29] : memref<1x8x512xf32, #tpu.memory_space<vmem>>, vector<1x8x256xf32>
    %60 = vector.extract_strided_slice %22 {offsets = [4, 0, 0], sizes = [1, 8, 1], strides = [1, 1, 1]} : vector<9x8x1xf32> to vector<1x8x1xf32>
    %61 = vector.shape_cast %60 : vector<1x8x1xf32> to vector<8x1xf32>
    %62 = vector.shape_cast %61 : vector<8x1xf32> to vector<1x8x1xf32>
    %63 = vector.broadcast %62 : vector<1x8x1xf32> to vector<1x8x256xf32>
    %64 = arith.mulf %63, %59 : vector<1x8x256xf32>
    %65 = arith.addf %58, %64 : vector<1x8x256xf32>
    %c0_30 = arith.constant 0 : index
    %c0_31 = arith.constant 0 : index
    %c144 = arith.constant 144 : index
    %66 = vector.load %arg6[%c0_30, %c0_31, %c144] : memref<1x8x512xf32, #tpu.memory_space<vmem>>, vector<1x8x256xf32>
    %67 = vector.extract_strided_slice %22 {offsets = [7, 0, 0], sizes = [1, 8, 1], strides = [1, 1, 1]} : vector<9x8x1xf32> to vector<1x8x1xf32>
    %68 = vector.shape_cast %67 : vector<1x8x1xf32> to vector<8x1xf32>
    %69 = vector.shape_cast %68 : vector<8x1xf32> to vector<1x8x1xf32>
    %70 = vector.broadcast %69 : vector<1x8x1xf32> to vector<1x8x256xf32>
    %71 = arith.mulf %70, %66 : vector<1x8x256xf32>
    %72 = arith.addf %65, %71 : vector<1x8x256xf32>
    %73 = arith.addf %52, %72 : vector<1x8x256xf32>
    %c0_32 = arith.constant 0 : index
    %c0_33 = arith.constant 0 : index
    %c113 = arith.constant 113 : index
    %74 = vector.load %arg6[%c0_32, %c0_33, %c113] : memref<1x8x512xf32, #tpu.memory_space<vmem>>, vector<1x8x256xf32>
    %75 = vector.extract_strided_slice %22 {offsets = [2, 0, 0], sizes = [1, 8, 1], strides = [1, 1, 1]} : vector<9x8x1xf32> to vector<1x8x1xf32>
    %76 = vector.shape_cast %75 : vector<1x8x1xf32> to vector<8x1xf32>
    %77 = vector.shape_cast %76 : vector<8x1xf32> to vector<1x8x1xf32>
    %78 = vector.broadcast %77 : vector<1x8x1xf32> to vector<1x8x256xf32>
    %79 = arith.mulf %78, %74 : vector<1x8x256xf32>
    %c0_34 = arith.constant 0 : index
    %c0_35 = arith.constant 0 : index
    %c129 = arith.constant 129 : index
    %80 = vector.load %arg6[%c0_34, %c0_35, %c129] : memref<1x8x512xf32, #tpu.memory_space<vmem>>, vector<1x8x256xf32>
    %81 = vector.extract_strided_slice %22 {offsets = [5, 0, 0], sizes = [1, 8, 1], strides = [1, 1, 1]} : vector<9x8x1xf32> to vector<1x8x1xf32>
    %82 = vector.shape_cast %81 : vector<1x8x1xf32> to vector<8x1xf32>
    %83 = vector.shape_cast %82 : vector<8x1xf32> to vector<1x8x1xf32>
    %84 = vector.broadcast %83 : vector<1x8x1xf32> to vector<1x8x256xf32>
    %85 = arith.mulf %84, %80 : vector<1x8x256xf32>
    %86 = arith.addf %79, %85 : vector<1x8x256xf32>
    %c0_36 = arith.constant 0 : index
    %c0_37 = arith.constant 0 : index
    %c145 = arith.constant 145 : index
    %87 = vector.load %arg6[%c0_36, %c0_37, %c145] : memref<1x8x512xf32, #tpu.memory_space<vmem>>, vector<1x8x256xf32>
    %88 = vector.extract_strided_slice %22 {offsets = [8, 0, 0], sizes = [1, 8, 1], strides = [1, 1, 1]} : vector<9x8x1xf32> to vector<1x8x1xf32>
    %89 = vector.shape_cast %88 : vector<1x8x1xf32> to vector<8x1xf32>
    %90 = vector.shape_cast %89 : vector<8x1xf32> to vector<1x8x1xf32>
    %91 = vector.broadcast %90 : vector<1x8x1xf32> to vector<1x8x256xf32>
    %92 = arith.mulf %91, %87 : vector<1x8x256xf32>
    %93 = arith.addf %86, %92 : vector<1x8x256xf32>
    %c15_i32 = arith.constant 15 : i32
    %94 = vector.broadcast %c15_i32 : i32 to vector<1x1x256xi32>
    %95 = arith.cmpi slt, %21, %94 : vector<1x1x256xi32>
    %cst_38 = arith.constant 0.000000e+00 : f32
    %96 = vector.shape_cast %95 : vector<1x1x256xi1> to vector<1x1x256xi1>
    %97 = vector.broadcast %96 : vector<1x1x256xi1> to vector<1x8x256xi1>
    %98 = vector.broadcast %cst_38 : f32 to vector<1x8x256xf32>
    %99 = arith.select %97, %93, %98 : vector<1x8x256xi1>, vector<1x8x256xf32>
    %100 = arith.addf %73, %99 : vector<1x8x256xf32>
    %101 = vector.extract_strided_slice %100 {offsets = [0, 0, 0], sizes = [1, 4, 256], strides = [1, 1, 1]} : vector<1x8x256xf32> to vector<1x4x256xf32>
    %102 = arith.mulf %101, %101 : vector<1x4x256xf32>
    %cst_39 = arith.constant dense<0.000000e+00> : vector<1x256xf32>
    %103 = vector.multi_reduction <add>, %102, %cst_39 [1] : vector<1x4x256xf32> to vector<1x256xf32>
    %104 = vector.shape_cast %103 : vector<1x256xf32> to vector<1x1x256xf32>
    %cst_40 = arith.constant 1.000000e-30 : f32
    %105 = vector.broadcast %cst_40 : f32 to vector<1x1x256xf32>
    %106 = arith.addf %104, %105 : vector<1x1x256xf32>
    %107 = math.rsqrt %106 : vector<1x1x256xf32>
    %108 = arith.mulf %104, %107 : vector<1x1x256xf32>
    %cst_41 = arith.constant 0.000000e+00 : f32
    %109 = vector.broadcast %cst_41 : f32 to vector<1x1x256xf32>
    %110 = arith.subf %109, %108 : vector<1x1x256xf32>
    %111 = math.exp %110 : vector<1x1x256xf32>
    %cst_42 = arith.constant 1.000000e+00 : f32
    %112 = vector.broadcast %cst_42 : f32 to vector<1x1x256xf32>
    %113 = arith.subf %112, %111 : vector<1x1x256xf32>
    %114 = arith.mulf %113, %107 : vector<1x1x256xf32>
    %115 = vector.broadcast %114 : vector<1x1x256xf32> to vector<1x4x256xf32>
    %116 = arith.mulf %101, %115 : vector<1x4x256xf32>
    %c0_43 = arith.constant 0 : index
    %c0_44 = arith.constant 0 : index
    %c0_45 = arith.constant 0 : index
    %117 = vector.load %arg5[%c0_43, %c0_44, %c0_45] : memref<1x8x256xf32, #tpu.memory_space<vmem>>, vector<1x4x256xf32>
    tpu.vector_store %arg5[%c0_43, %c0_44, %c0_45], %116 {strides = array<i32>} : memref<1x8x256xf32, #tpu.memory_space<vmem>>, vector<1x4x256xf32>,
    %118 = vector.extract_strided_slice %100 {offsets = [0, 4, 0], sizes = [1, 4, 256], strides = [1, 1, 1]} : vector<1x8x256xf32> to vector<1x4x256xf32>
    %119 = arith.mulf %118, %118 : vector<1x4x256xf32>
    %cst_46 = arith.constant dense<0.000000e+00> : vector<1x256xf32>
    %120 = vector.multi_reduction <add>, %119, %cst_46 [1] : vector<1x4x256xf32> to vector<1x256xf32>
    %121 = vector.shape_cast %120 : vector<1x256xf32> to vector<1x1x256xf32>
    %cst_47 = arith.constant 1.000000e-30 : f32
    %122 = vector.broadcast %cst_47 : f32 to vector<1x1x256xf32>
    %123 = arith.addf %121, %122 : vector<1x1x256xf32>
    %124 = math.rsqrt %123 : vector<1x1x256xf32>
    %125 = arith.mulf %121, %124 : vector<1x1x256xf32>
    %cst_48 = arith.constant 0.000000e+00 : f32
    %126 = vector.broadcast %cst_48 : f32 to vector<1x1x256xf32>
    %127 = arith.subf %126, %125 : vector<1x1x256xf32>
    %128 = math.exp %127 : vector<1x1x256xf32>
    %cst_49 = arith.constant 1.000000e+00 : f32
    %129 = vector.broadcast %cst_49 : f32 to vector<1x1x256xf32>
    %130 = arith.subf %129, %128 : vector<1x1x256xf32>
    %131 = arith.mulf %130, %124 : vector<1x1x256xf32>
    %132 = vector.broadcast %131 : vector<1x1x256xf32> to vector<1x4x256xf32>
    %133 = arith.mulf %118, %132 : vector<1x4x256xf32>
    %c0_50 = arith.constant 0 : index
    %c4 = arith.constant 4 : index
    %c0_51 = arith.constant 0 : index
    %134 = vector.load %arg5[%c0_50, %c4, %c0_51] : memref<1x8x256xf32, #tpu.memory_space<vmem>>, vector<1x4x256xf32>
    tpu.vector_store %arg5[%c0_50, %c4, %c0_51], %133 {strides = array<i32>} : memref<1x8x256xf32, #tpu.memory_space<vmem>>, vector<1x4x256xf32>,
    return
  }
  func.func @transform_0(%arg0: i32, %arg1: i32) -> (i32, i32, i32) {
    %c0_i32 = arith.constant 0 : i32
    %c0_i32_0 = arith.constant 0 : i32
    return %arg0, %arg1, %c0_i32 : i32, i32, i32
  }
  func.func @transform_1(%arg0: i32, %arg1: i32) -> (i32, i32, i32) {
    %c0_i32 = arith.constant 0 : i32
    %c0_i32_0 = arith.constant 0 : i32
    %c0_i32_1 = arith.constant 0 : i32
    return %c0_i32, %arg1, %c0_i32_0 : i32, i32, i32
  }
  func.func @transform_2(%arg0: i32, %arg1: i32) -> (i32, i32) {
    %c0_i32 = arith.constant 0 : i32
    %c0_i32_0 = arith.constant 0 : i32
    return %arg1, %c0_i32 : i32, i32
  }
  func.func @transform_3(%arg0: i32, %arg1: i32) -> (i32, i32, i32) {
    %c0_i32 = arith.constant 0 : i32
    %c0_i32_0 = arith.constant 0 : i32
    return %arg0, %arg1, %c0_i32 : i32, i32, i32
  }
}

</mosaic_0001>

<bundles_post_ra>
// kernel: tpu_custom_call.1
= control target key start
LH: loop header
LB: loop body
LE: loop exit
PB: predicated region body
PF: predicated region fallthrough
CT: control target
= control target key end

     0   :  { %8 = vsyncpa [#allocation4], 0  ;;  %s1139_s0 = inlined_call_operand.vmem [shape: f32[2,8,256], index: 0, kind: input, shape index: {}]   ;;  %s1140_s1 = inlined_call_operand.vmem [shape: f32[9,8,1], index: 1, kind: input, shape index: {}]   ;;  %s1141_s2 = inlined_call_operand.vmem [shape: f32[8,1], index: 2, kind: input, shape index: {}]   ;;  %s1142_s3 = inlined_call_operand.hbm [shape: f32[2,8,256], index: 3, kind: output, shape index: {}]  }
   0x1   :  { %10 = vsyncpa [#allocation4 + $0x1], 0  ;;  %s926_s12 = smov 0   ;;  %s928_s13 = smov 0  }
   0x2   :  { %s930_s14 = smov 0   ;;  %s932_s15 = smov 0  }
   0x3   :  { %s934_s16 = smov 0   ;;  %s936_s17 = smov 0  }
   0x4 LB: > { %s723_s18 = sadd.s32 4294967295, %s897_s17   ;;  %s724_s19 = sadd.s32 4294967294, %s897_s17   ;;  %s897_s17 = sphi %s936_s17, %s16_s17   ;;  %s893_s16 = sphi %s934_s16, %s1149_s16   ;;  %s889_s15 = sphi %s932_s15, %s1148_s15   ;;  %s885_s14 = sphi %s930_s14, %s1147_s14   ;;  %s881_s13 = sphi %s928_s13, %s1146_s13   ;;  %s877_s12 = sphi %s926_s12, %s1145_s12  }
   0x5   : > { %s28_s20 = sadd.s32 1, %s893_s16  ;;  %s117_s21 = sadd.s32 1, %s885_s14 }
   0x6   : > { %p30_p0 = scmp.ge.s32.totalorder %s28_s20, 2  ;;  %p127_p1 = scmp.ne.s32.totalorder %s885_s14, %s881_s13 }
   0x7   : > { %p128_p2 = scmp.eq.s32.totalorder %s723_s18, 1  ;;  %p133_p3 = scmp.ne.s32.totalorder %s881_s13, %s877_s12 }
   0x8   : > { %s1151_s20 = smov (%p30_p0, %s28_s20), 0  ;;  %p134_p5 = scmp.eq.s32.totalorder %s724_s19, 1 }
   0x9   : > { %p966_p4 = por %p128_p2, %p127_p1  ;;  %s112_s23 = ssub.s32 %s893_s16, %s1151_s20 }
   0xa   : > { %p729_p6 = scmp.ge.s32.totalorder %s897_s17, 1  ;;  %p115_p7 = scmp.eq.s32.totalorder %s112_s23, 0 }
   0xb   : > { %p973_p8 = por %p134_p5, %p133_p3  ;;  %p178_p9 = scmp.lt.s32.totalorder %s897_s17, 3 }
   0xc   : > { %s979_s25 = scalar_select %p115_p7, %s885_s14, %s117_s21  }
   0xd   : > { %p179_p10 = pnand %p729_p6, %p178_p9 }
   0xe   : > { %v268_v0 = vld [vmem:[%s1140_s1 + $0x20] sm:$0xff] (!%p179_p10)  ;;  %v267_v1 = vld [vmem:[%s1140_s1 + $0x18] sm:$0xff] (!%p179_p10)  ;;  %v899_v2 = vmov (!%p179_p10), 0   ;;  %v269_v3 = vld [vmem:[%s1140_s1 + $0x28] sm:$0xff] (!%p179_p10)  ;;  %p214_p11 = scmp.lt.s32.totalorder (!%p179_p10), %s889_s15, 1  ;;  %s900_s5 = smov (!%p179_p10), 112  }
   0xf   : > { %182 = sbr.rel (%p179_p10) target bundleno = 489 (0x1e9), region = 32  ;;  %802 = vset.pattern.permute.xlu1 (!%p179_p10), %v899_v2  ;;  %801 = vset.pattern.permute.xlu0 (!%p179_p10), %v899_v2  ;;  %v270_v4 = vld [vmem:[%s1140_s1 + $0x30] sm:$0xff] (!%p179_p10)  ;;  %v272_v5 = vld [vmem:[%s1140_s1 + $0x40] sm:$0xff] (!%p179_p10)  ;;  %v271_v6 = vld [vmem:[%s1140_s1 + $0x38] sm:$0xff] (!%p179_p10)  ;;  %s901_s6 = smov (!%p179_p10), 96   ;;  %vm336_vm0 = vcmask (!%p179_p10), 785408  }
  0x10   : > { %379 = vperm.xlu1 (!%p179_p10), %802, %v268_v0   ;;  %292 = vperm.xlu0 (!%p179_p10), %801, %v267_v1   ;;  %v265_v7 = vld [vmem:[%s1140_s1 + $0x8] sm:$0xff] (!%p179_p10)  ;;  %v264_v8 = vld [vmem:[%s1140_s1] sm:$0xff] (!%p179_p10)  ;;  %v266_v9 = vld [vmem:[%s1140_s1 + $0x10] sm:$0xff] (!%p179_p10)  ;;  %s902_s9 = smov (!%p179_p10), 17   ;;  %vm307_vm1 = vcmask (!%p179_p10), 916480   ;;  %s903_s10 = smov (!%p179_p10), 16  }
  0x11   : > { %v273_v34 = vld [vmem:[%s1141_s2] sm:$0xff] (!%p179_p10)  ;;  %s904_s11 = smov (!%p179_p10), 15   ;;  %vm360_vm2 = vcmask (!%p179_p10), 138240   ;;  %vm511_vm5 = vcmask (!%p179_p10), 121856   ;;  %vm431_vm6 = vcmask (!%p179_p10), 130048   ;;  %vm522_vm9 = vcmask (!%p179_p10), 1043456  }
  0x12   : > { %s211_s18 = sand.u32 (!%p179_p10), 1, %s881_s13   ;;  %s739_s23 = sshll.u32 (!%p179_p10), %s889_s15, 8 }
  0x13   : > { %s730_s19 = sshll.u32 (!%p179_p10), %s211_s18, 4  ;;  %s1092_s29 = scalar_lea.hbm (!%p179_p10), %s1142_s3, %s739_s23 }
  0x14   : > { %448 = vperm.xlu1 (!%p179_p10), %802, %v269_v3   ;;  %321 = vperm.xlu0 (!%p179_p10), %801, %v270_v4   ;;  %s213_s21 = scalar_lea.vmem (!%p179_p10), [#allocation3], %s730_s19 }
  0x15   : > { %s614_s26 = sshll.u32 (!%p179_p10), %s213_s21, 4  ;;  %s1094_s26 = int_to_ptr.vmem [resolvable:$true] %s614_s26 }
  0x16   : > { %s215_s27 = scalar_select %p214_p11, %s889_s15, 1 }
  0x17   : > { %s598_s15 = scalar_lea.sflag [#allocation4], %s211_s18  ;;  %s819_s30 = scalar_lea.vmem %s1094_s26, 256 }
  0x18   : > { %473 = vperm.xlu1 %802, %v272_v5   ;;  %399 = vperm.xlu0 %801, %v271_v6   ;;  %s738_s28 = sshll.u32 %s215_s27, 4  ;;  %p820_p12 = scmp.ne.s32.totalorder %s1094_s26, %s819_s30 }
  0x19   : > { %s222_s4 = scalar_lea.vmem %s1139_s0, %s738_s28 }
  0x1a   : > { %v1013_v10 = vld [vmem:[%s222_s4] sm:$0xff]  ;;  %v1016_v14 = vld [vmem:[%s222_s4 + $0x8] sm:$0xff]  ;;  %p821_p13 = pnand %p820_p12, %p966_p4  ;;  %s905_s4 = smov [#allocation3]  }
  0x1c   : > { %371 = vperm.xlu1 %802, %v265_v7   ;;  %284 = vperm.xlu0 %801, %v264_v8   ;;  %p822_p0 = pneg %p821_p13 }
  0x20   : > { %440 = vperm.xlu0 %801, %v266_v9  }
  0x8f   : > { %v293_v11 = vpop.permute.xlu0 %292  ;;  %v380_v20 = vpop.permute.xlu1 %379 }
  0x90   : > { %v295_v12 = vmul.f32 0.0, %v293_v11  ;;  %v296_v13 = vmul.f32 %v293_v11, %v1013_v10  ;;  %v297_v16 = vmul.f32 %v293_v11, %v1016_v14  ;;  %v382_v21 = vmul.f32 %v380_v20, %v1013_v10 }
  0x91   : > { %v383_v22 = vmul.f32 %v380_v20, %v1016_v14 }
  0x92   : > { %301 = vrot.lane.b32.xlu1 %v295_v12, %s900_s5  ;;  %303 = vrot.lane.b32.xlu0 %v296_v13, %s900_s5 }
  0x93   : > { %v322_v15 = vpop.permute.xlu0 %321  ;;  %v449_v23 = vpop.permute.xlu1 %448 }
  0x94   : > { %v324_v17 = vmul.f32 %v322_v15, %v1013_v10  ;;  %v325_v18 = vmul.f32 %v322_v15, %v1016_v14  ;;  %v326_v19 = vmul.f32 0.0, %v322_v15  ;;  %v451_v24 = vmul.f32 %v449_v23, %v1013_v10 }
  0x95   : > { %v452_v25 = vmul.f32 %v449_v23, %v1016_v14  ;;  %v453_v27 = vmul.f32 0.0, %v449_v23 }
  0x96   : > { %305 = vrot.lane.b32.xlu1 %v297_v16, %s900_s5  ;;  %330 = vrot.lane.b32.xlu0 %v324_v17, %s901_s6 }
  0x97   : > { %v400_v26 = vpop.permute.xlu0 %399  ;;  %v474_v31 = vpop.permute.xlu1 %473 }
  0x98   : > { %v402_v28 = vmul.f32 %v400_v26, %v1013_v10  ;;  %v403_v29 = vmul.f32 %v400_v26, %v1016_v14  ;;  %v404_v30 = vmul.f32 0.0, %v400_v26  ;;  %v476_v32 = vmul.f32 %v474_v31, %v1013_v10 }
  0x99   : > { %v477_v33 = vmul.f32 %v474_v31, %v1016_v14  ;;  %v478_v35 = vmul.f32 0.0, %v474_v31 }
  0x9a   : > { %332 = vrot.lane.b32.xlu1 %v325_v18, %s901_s6  ;;  %334 = vrot.lane.b32.xlu0 %v326_v19, %s901_s6 }
  0x9b   : > { %v285_v36 = vpop.permute.xlu0 %284  ;;  %v372_v37 = vpop.permute.xlu1 %371 }
  0x9c   : > { %v289_v43 = vmul.f32 %v285_v36, %v1016_v14  ;;  %v374_v53 = vmul.f32 0.0, %v372_v37  ;;  %v376_v58 = vmul.f32 %v372_v37, %v1016_v14  ;;  %v288_v1 = vmul.f32 %v285_v36, %v1013_v10 }
  0x9d   : > { %v287_v4 = vmul.f32 0.0, %v285_v36  ;;  %v375_v20 = vmul.f32 %v372_v37, %v1013_v10 }
  0x9e   : > { %386 = vrot.lane.b32.xlu1 %v382_v21, %s900_s5  ;;  %388 = vrot.lane.b32.xlu0 %v383_v22, %s900_s5 }
  0x9f   : > { %v1041_v38 = vpop.permute.xlu0 %440 }
  0xa0   : > { %v443_v62 = vmul.f32 0.0, %v1041_v38  ;;  %v444_v15 = vmul.f32 %v1041_v38, %v1013_v10 }
  0xa2   : > { %457 = vrot.lane.b32.xlu1 %v451_v24, %s900_s5  ;;  %459 = vrot.lane.b32.xlu0 %v452_v25, %s900_s5 }
  0xa6   : > { %461 = vrot.lane.b32.xlu1 %v453_v27, %s900_s5  ;;  %408 = vrot.lane.b32.xlu0 %v402_v28, %s901_s6  ;;  %v445_v27 = vmul.f32 %v1041_v38, %v1016_v14  ;;  %s823_s5 = sshll.u32 %s905_s4, 4  ;;  %s824_s5 = int_to_ptr.vmem [resolvable:$false] %s823_s5 }
  0xa7   : > { %p826_p1 = scmp.lt.s32.totalorder %s1094_s26, %s824_s5 }
  0xaa   : > { %410 = vrot.lane.b32.xlu1 %v403_v29, %s901_s6  ;;  %412 = vrot.lane.b32.xlu0 %v404_v30, %s901_s6 }
  0xae   : > { %482 = vrot.lane.b32.xlu1 %v476_v32, %s901_s6  ;;  %484 = vrot.lane.b32.xlu0 %v477_v33, %s901_s6  ;;  %v237_v32 = vlaneseq }
  0xb2   : > { %486 = vrot.lane.b32.xlu1 %v478_v35, %s901_s6  ;;  %276 = vperm.xlu0 %801, %v273_v34   ;;  %v238_v34 = vand.u32 127, %v237_v32  ;;  %s825_s6 = scalar_lea.vmem %s824_s5, 512 }
  0xb3   : > { %p827_p2 = scmp.lt.s32.totalorder %s825_s6, %s819_s30 }
  0xb4   : > { %v239_v37 = vadd.s32 128, %v238_v34 }
  0xb5   : > { %p828_p3 = por %p827_p2, %p826_p1 }
  0xb7   : > { %p829_p5 = pnand %p828_p3, %p822_p0 }
 0x104   : > { %v302_v39 = vpop.permute.xlu1 %301  ;;  %v304_v40 = vpop.permute.xlu0 %303 }
 0x105   : > { %v308_v2 = vsel %vm307_vm1, %v302_v39, %v304_v40  ;;  %v244_v39 = vand.u32 15, %v238_v34 }
 0x106   : > { %v313_v11 = vadd.f32 %v308_v2, %v287_v4 }
 0x107   : > { %vm345_vm3 = vcmp.ge.s32.totalorder %v244_v39, 1  ;;  %vm496_vm7 = vcmp.lt.s32.totalorder %v244_v39, 15 }
 0x108   : > { %v306_v41 = vpop.permute.xlu1 %305  ;;  %v331_v42 = vpop.permute.xlu0 %330 }
 0x109   : > { %v315_v44 = vadd.f32 %v306_v41, %v289_v43  ;;  %v309_v63 = vsel %vm307_vm1, %v304_v40, %v306_v41  ;;  %v342_v21 = vadd.f32 %v331_v42, %v313_v11  ;;  %v251_v41 = vand.u32 15, %v239_v37 }
 0x10a   : > { %v314_v7 = vadd.f32 %v309_v63, %v288_v1 }
 0x10b   : > { %vm346_vm4 = vcmp.ge.s32.totalorder %v251_v41, 1  ;;  %vm497_vm8 = vcmp.lt.s32.totalorder %v251_v41, 15 }
 0x10c   : > { %v333_v45 = vpop.permute.xlu1 %332  ;;  %v335_v46 = vpop.permute.xlu0 %334 }
 0x10d   : > { %v338_v47 = vsel %vm336_vm0, %v333_v45, %v335_v46  ;;  %v337_v5 = vsel %vm336_vm0, %v331_v42, %v333_v45 }
 0x10e   : > { %v344_v48 = vadd.f32 %v338_v47, %v315_v44  ;;  %v343_v16 = vadd.f32 %v337_v5, %v314_v7 }
 0x110   : > { %v387_v49 = vpop.permute.xlu1 %386  ;;  %358 = vrot.lane.b32.xlu1 %v344_v48, %s902_s9  ;;  %v389_v50 = vpop.permute.xlu0 %388 }
 0x111   : > { %v394_v54 = vadd.f32 %v387_v49, %v374_v53  ;;  %v396_v59 = vadd.f32 %v389_v50, %v376_v58  ;;  %v390_v18 = vsel %vm307_vm1, %v387_v49, %v389_v50 }
 0x112   : > { %v395_v24 = vadd.f32 %v390_v18, %v375_v20 }
 0x114   : > { %v458_v51 = vpop.permute.xlu1 %457  ;;  %v460_v52 = vpop.permute.xlu0 %459 }
 0x115   : > { %v468_v6 = vadd.f32 %v458_v51, %v443_v62  ;;  %v463_v12 = vsel %vm307_vm1, %v458_v51, %v460_v52 }
 0x116   : > { %v469_v19 = vadd.f32 %v463_v12, %v444_v15 }
 0x118   : > { %v462_v55 = vpop.permute.xlu1 %461  ;;  %v409_v56 = vpop.permute.xlu0 %408 }
 0x119   : > { %v419_v57 = vadd.f32 %v409_v56, %v394_v54  ;;  %v464_v26 = vsel %vm307_vm1, %v460_v52, %v462_v55 }
 0x11a   : > { %v470_v30 = vadd.f32 %v464_v26, %v445_v27 }
 0x11b   : > { %425 = vrot.lane.b32.xlu0 %v419_v57, %s903_s10 }
 0x11c   : > { %v411_v60 = vpop.permute.xlu1 %410  ;;  %v413_v61 = vpop.permute.xlu0 %412 }
 0x11d   : > { %v415_v0 = vsel %vm336_vm0, %v411_v60, %v413_v61  ;;  %v414_v22 = vsel %vm336_vm0, %v409_v56, %v411_v60 }
 0x11e   : > { %v421_v3 = vadd.f32 %v415_v0, %v396_v59  ;;  %v420_v28 = vadd.f32 %v414_v22, %v395_v24 }
 0x120   : > { %v483_v8 = vpop.permute.xlu1 %482  ;;  %429 = vrot.lane.b32.xlu0 %v421_v3, %s903_s10  ;;  %v485_v9 = vpop.permute.xlu0 %484 }
 0x121   : > { %v493_v13 = vadd.f32 %v483_v8, %v468_v6  ;;  %v488_v17 = vsel %vm336_vm0, %v483_v8, %v485_v9 }
 0x122   : > { %v494_v23 = vadd.f32 %v488_v17, %v469_v19 }
 0x123   : > { %505 = vrot.lane.b32.xlu1 %v493_v13, %s904_s11 }
 0x124   : > { %356 = vrot.lane.b32.xlu0 %v343_v16, %s902_s9  ;;  %v487_v25 = vpop.permute.xlu1 %486 }
 0x125   : > { %v489_v29 = vsel %vm336_vm0, %v485_v9, %v487_v25 }
 0x126   : > { %v495_v10 = vadd.f32 %v489_v29, %v470_v30 }
 0x127   : > { %354 = vrot.lane.b32.xlu1 %v342_v21, %s902_s9 }
 0x128   : > { %507 = vrot.lane.b32.xlu0 %v494_v23, %s904_s11 }
 0x12b   : > { %427 = vrot.lane.b32.xlu1 %v420_v28, %s903_s10 }
 0x12f   : > { %509 = vrot.lane.b32.xlu1 %v495_v10, %s904_s11 }
 0x131   : > { %v277_v31 = vpop.permute.xlu0 %276 }
 0x182   : > { %v359_v35 = vpop.permute.xlu1 %358 }
 0x18d   : > { %v426_v33 = vpop.permute.xlu0 %425 }
 0x192   : > { %v430_v36 = vpop.permute.xlu0 %429 }
 0x195   : > { %v506_v40 = vpop.permute.xlu1 %505 }
 0x196   : > { %v357_v42 = vpop.permute.xlu0 %356 }
 0x197   : > { %v362_v38 = vsel %vm360_vm2, %v357_v42, %v359_v35 }
 0x198   : > { %v366_v47 = vsel %vm346_vm4, %v362_v38, 0.0 }
 0x199   : > { %v355_v14 = vpop.permute.xlu1 %354  ;;  %v368_v53 = vadd.f32 %v366_v47, %v277_v31 }
 0x19a   : > { %v361_v43 = vsel %vm360_vm2, %v355_v14, %v357_v42  ;;  %v508_v44 = vpop.permute.xlu0 %507 }
 0x19b   : > { %v365_v45 = vsel %vm345_vm3, %v361_v43, 0.0  ;;  %v512_v48 = vsel %vm511_vm5, %v506_v40, %v508_v44 }
 0x19c   : > { %v367_v46 = vadd.f32 %v365_v45, %v277_v31  ;;  %v516_v54 = vsel %vm496_vm7, %v512_v48, 0.0 }
 0x19d   : > { %v428_v49 = vpop.permute.xlu1 %427 }
 0x19e   : > { %v432_v50 = vsel %vm431_vm6, %v426_v33, %v428_v49  ;;  %v433_v51 = vsel %vm431_vm6, %v428_v49, %v430_v36 }
 0x19f   : > { %v436_v52 = vadd.f32 %v432_v50, %v367_v46  ;;  %v437_v57 = vadd.f32 %v433_v51, %v368_v53 }
 0x1a1   : > { %v1070_v55 = vadd.f32 %v516_v54, %v436_v52  ;;  %v510_v56 = vpop.permute.xlu1 %509 }
 0x1a2   : > { %v513_v58 = vsel %vm511_vm5, %v508_v44, %v510_v56 }
 0x1a3   : > { %v520_v59 = vmul.f32 %v1070_v55, %v1070_v55  ;;  %v517_v60 = vsel %vm497_vm8, %v513_v58, 0.0 }
 0x1a4   : > { %v1075_v61 = vadd.f32 %v517_v60, %v437_v57 }
 0x1a5   : > { %v523_v62 = vsel %vm522_vm9, %v520_v59, 0.0  ;;  %v559_v63 = vrot.slane %v520_v59, 4 }
 0x1a6   : > { %v524_v0 = vrot.slane %v523_v62, 4  ;;  %v521_v1 = vmul.f32 %v1075_v61, %v1075_v61 }
 0x1a7   : > { %v563_v2 = vsel %vm522_vm9, %v559_v63, 0.0 }
 0x1a8   : > { %v525_v3 = vadd.f32 %v524_v0, %v523_v62  ;;  %v564_v4 = vrot.slane %v563_v2, 4  ;;  %v530_v5 = vsel %vm522_vm9, %v521_v1, 0.0  ;;  %v560_v6 = vrot.slane %v521_v1, 4 }
 0x1a9   : > { %v531_v7 = vrot.slane %v530_v5, 4 }
 0x1aa   : > { %v526_v8 = vrot.slane %v525_v3, 2  ;;  %v565_v9 = vadd.f32 %v564_v4, %v563_v2  ;;  %v570_v11 = vsel %vm522_vm9, %v560_v6, 0.0 }
 0x1ab   : > { %v532_v12 = vadd.f32 %v531_v7, %v530_v5  ;;  %v571_v13 = vrot.slane %v570_v11, 4 }
 0x1ac   : > { %v527_v15 = vadd.f32 %v526_v8, %v525_v3  ;;  %v566_v16 = vrot.slane %v565_v9, 2 }
 0x1ad   : > { %v533_v17 = vrot.slane %v532_v12, 2  ;;  %v572_v18 = vadd.f32 %v571_v13, %v570_v11 }
 0x1ae   : > { %v528_v19 = vrot.slane %v527_v15, 1  ;;  %v567_v20 = vadd.f32 %v566_v16, %v565_v9 }
 0x1af   : > { %v534_v21 = vadd.f32 %v533_v17, %v532_v12  ;;  %v573_v22 = vrot.slane %v572_v18, 2 }
 0x1b0   : > { %v529_v23 = vadd.f32 %v528_v19, %v527_v15  ;;  %v568_v24 = vrot.slane %v567_v20, 1 }
 0x1b1   : > { %v535_v25 = vrot.slane %v534_v21, 1  ;;  %v574_v26 = vadd.f32 %v573_v22, %v572_v18 }
 0x1b2   : > { %v537_v27 = vadd.f32 1e-30, %v529_v23  ;;  %v569_v28 = vadd.f32 %v568_v24, %v567_v20 }
 0x1b3   : > { %v536_v29 = vadd.f32 %v535_v25, %v534_v21  ;;  %v575_v30 = vrot.slane %v574_v26, 1 }
 0x1b4   : > { %803 = vrsqrt.f32 %v537_v27  ;;  %v577_v10 = vadd.f32 1e-30, %v569_v28 }
 0x1b5   : > { %v538_v31 = vadd.f32 1e-30, %v536_v29  ;;  %v576_v32 = vadd.f32 %v575_v30, %v574_v26 }
 0x1b6   : > { %805 = vrsqrt.f32 %v577_v10 }
 0x1b7   : > { %807 = vrsqrt.f32 %v538_v31  ;;  %v578_v33 = vadd.f32 1e-30, %v576_v32 }
 0x1b9   : > { %809 = vrsqrt.f32 %v578_v33 }
 0x1be   : > { %v804_v34 = vpop.eup %803 }
 0x1bf   : > { %v541_v35 = vmul.f32 %v804_v34, %v529_v23 }
 0x1c0   : > { %v806_v36 = vpop.eup %805 }
 0x1c1   : > { %v808_v37 = vpop.eup %807  ;;  %v543_v39 = vsub.f32 0.0, %v541_v35  ;;  %v581_v40 = vmul.f32 %v806_v36, %v569_v28 }
 0x1c2   : > { %v542_v41 = vmul.f32 %v808_v37, %v536_v29 }
 0x1c3   : > { %v810_v42 = vpop.eup %809  ;;  %v545_v14 = vmul.f32 1.442695, %v543_v39  ;;  %v583_v38 = vsub.f32 0.0, %v581_v40 }
 0x1c4   : > { %v544_v43 = vsub.f32 0.0, %v542_v41  ;;  %v582_v44 = vmul.f32 %v810_v42, %v576_v32 }
 0x1c5   : > { %811 = vpow2.f32 %v545_v14  ;;  %v585_v45 = vmul.f32 1.442695, %v583_v38 }
 0x1c6   : > { %v547_v46 = vmul.f32 1.442695, %v544_v43  ;;  %v584_v47 = vsub.f32 0.0, %v582_v44 }
 0x1c7   : > { %813 = vpow2.f32 %v585_v45 }
 0x1c8   : > { %815 = vpow2.f32 %v547_v46  ;;  %v587_v48 = vmul.f32 1.442695, %v584_v47 }
 0x1ca   : > { %817 = vpow2.f32 %v587_v48 }
 0x1cf   : > { %v812_v49 = vpop.eup %811 }
 0x1d0   : > { %v549_v50 = vsub.f32 1.0, %v812_v49 }
 0x1d1   : > { %v814_v51 = vpop.eup %813 }
 0x1d2   : > { %v816_v52 = vpop.eup %815  ;;  %v551_v53 = vmul.f32 %v804_v34, %v549_v50  ;;  %v589_v54 = vsub.f32 1.0, %v814_v51 }
 0x1d3   : > { %v550_v56 = vsub.f32 1.0, %v816_v52 }
 0x1d4   : > { %v818_v57 = vpop.eup %817  ;;  %v553_v58 = vmul.f32 %v551_v53, %v1070_v55  ;;  %v591_v59 = vmul.f32 %v806_v36, %v589_v54 }
 0x1d5   : > { %v552_v60 = vmul.f32 %v808_v37, %v550_v56  ;;  %v590_v62 = vsub.f32 1.0, %v818_v57 }
 0x1d6   : > { %555 = vst [vmem:[%s213_s21] sm:$0xf] %v553_v58  ;;  %v593_v63 = vmul.f32 %v591_v59, %v1070_v55 }
 0x1d7   : > { %v554_v0 = vmul.f32 %v552_v60, %v1075_v61  ;;  %v592_v1 = vmul.f32 %v810_v42, %v590_v62 }
 0x1d8   : > { %595 = vst [vmem:[%s213_s21] sm:$0xf0] %v593_v63 }
 0x1d9   : > { %556 = vst [vmem:[%s213_s21 + $0x8] sm:$0xf] %v554_v0  ;;  %v594_v2 = vmul.f32 %v592_v1, %v1075_v61 }
 0x1db   : > { %596 = vst [vmem:[%s213_s21 + $0x8] sm:$0xf0] %v594_v2 }
 0x1dc   : > { %832 = shalt.err (!%p829_p5)
}
 0x1dd   : > { %s833_s7 = scalar_lea.hbm %s1092_s29, 256  ;;  %s837_s10 = scalar_lea.hbm %s1142_s3, 512 }
 0x1de   : > { %p834_p6 = scmp.ne.s32.totalorder %s1092_s29, %s833_s7  ;;  %p838_p10 = scmp.lt.u32.totalorder %s1092_s29, %s1142_s3 }
 0x1df   : > { %p839_p11 = scmp.lt.u32.totalorder %s837_s10, %s833_s7  ;;  %p841_p13 = scmp.lt.u32.totalorder %s833_s7, %s1092_s29 }
 0x1e0   : > { %p835_p7 = pnand %p834_p6, %p966_p4 }
 0x1e1   : > { %p840_p12 = por %p839_p11, %p838_p10 }
 0x1e2   : > { %p836_p9 = pneg %p835_p7 }
 0x1e3   : > { %p842_p0 = por %p841_p13, %p840_p12 }
 0x1e5   : > { %p843_p1 = pnand %p842_p0, %p836_p9 }
 0x1e7   : > { %846 = shalt.err (!%p843_p1)
}
 0x1e8   : > { %740 = dma.vmem_to_hbm [thread:$0]  (%p966_p4), %s1094_s26, 256, %s1092_s29, %s598_s15  }
 0x1e9 PF: > { %p746_p2 = scmp.ge.s32.totalorder %s897_s17, 2  ;;  %s626_s19 = sand.u32 1, %s877_s12  }
 0x1ea   : > { %s627_s21 = scalar_lea.sflag [#allocation4], %s626_s19 }
 0x1eb   : > { %p743_p3 = pnand %p746_p2, %p973_p8 }
 0x1ed   : > { %872 = dma.done.wait (!%p743_p3), %s627_s21, 256  }
 0x1ee   : > { %874 = vsyncadd (!%p743_p3), %s627_s21, 4294967040  ;;  %s16_s17 = sadd.s32 1, %s897_s17   ;;  %s1145_s12 = smov %s881_s13 }
 0x1ef   : > { %p13_p5 = scmp.ge.s32.totalorder %s16_s17, 4   ;;  %s1146_s13 = smov %s885_s14 }
 0x1f0   : > { %s1147_s14 = smov %s979_s25  ;;  %s1148_s15 = smov %s893_s16 }
 0x1f1   : > { %s1149_s16 = smov %s1151_s20  ;;  %15 = sbr.rel (!%p13_p5) target bundleno = 4 (0x4), region = 73 }
 0x1f8   :  { %632 = vsyncpa [#allocation4], 1 }
 0x1f9   :  { %634 = vsyncpa [#allocation4 + $0x1], 1 }

</bundles_post_ra>
